<compile_context>
chip_gen: v6e
topology: v6e:2x2x1
jax: 0.10.0
libtpu: 0.0.40
codegen_flags: <defaults>
</compile_context>

<pallas_src>
import functools
from typing import NamedTuple

import jax
import jax.numpy as jnp
from jax.experimental import pallas as pl
from jax.experimental.pallas import tpu as pltpu


def _round_up(a: int, b: int) -> int:
    return ((a + b - 1) // b) * b


def _cdiv(a: int, b: int) -> int:
    return (a + b - 1) // b


# ---------------------------------------------------------------------------
# Kernel
# ---------------------------------------------------------------------------
def _softmax_mean_log(logits, n_models: int, c_pad: int):
    """log(mean_m softmax(logits_m)) over M lane-aligned class blocks."""
    prob_sum = None
    for m in range(n_models):                       # static trace-time loop
        lg = logits[:, m * c_pad:(m + 1) * c_pad]   # 128-lane aligned slice
        mx = jnp.max(lg, axis=-1, keepdims=True)
        e = jnp.exp(lg - mx)                        # padded classes -> exp(-huge) = 0
        denom = jnp.sum(e, axis=-1, keepdims=True)
        # Fold the 1/M mean into the reciprocal (EUP vrcp, approx is fine
        # since it feeds a log).
        p = e * pl.reciprocal(denom * float(n_models), approx=True)
        prob_sum = p if prob_sum is None else prob_sum + p
    return jnp.log(prob_sum)


def _ensemble_kernel(x_ref, w_ref, b_ref, out_ref, acc_ref=None, *,
                     n_models: int, c_pad: int):
    """One grid step: one batch tile x one H (reduction) tile, all members.

    x_ref:   (TB, H_tile)        f32 (cast to W dtype in-kernel)
    w_ref:   (H_tile, M*C_pad)   bf16 (or f32), streamed over the K axis
    b_ref:   (1, M*C_pad)        f32, resident (padded classes get -1e30)
    out_ref: (TB, C_pad)         log-mean-probabilities
    acc_ref: (TB, M*C_pad) f32 scratch -- only present when the grid has a
             K (=H) reduction axis.
    """
    x = x_ref[...].astype(w_ref.dtype)              # VPU cast, free slot
    part = jnp.dot(x, w_ref[...], preferred_element_type=jnp.float32)

    if acc_ref is None:
        # Single K step: no scratch round-trip, compute and store directly.
        logits = part + b_ref[...]
        out_ref[...] = _softmax_mean_log(logits, n_models, c_pad).astype(out_ref.dtype)
    else:
        k = pl.program_id(1)
        nk = pl.num_programs(1)

        @pl.when(k == 0)
        def _init():
            acc_ref[...] = part

        @pl.when(k > 0)
        def _accumulate():
            acc_ref[...] = acc_ref[...] + part

        @pl.when(k == nk - 1)
        def _finalize():
            logits = acc_ref[...] + b_ref[...]
            out_ref[...] = _softmax_mean_log(logits, n_models, c_pad).astype(out_ref.dtype)


# ---------------------------------------------------------------------------
# One-time parameter prepacking (hoisted out of the per-call HBM path)
# ---------------------------------------------------------------------------
class EnsembleParams(NamedTuple):
    w_all: jax.Array        # (H, M*C_pad), stream dtype, padded cols are 0
    b_all: jax.Array        # (1, M*C_pad), f32, padded cols are -1e30
    n_models: int
    n_classes: int
    c_pad: int
    hidden: int


def prepack_ensemble_params(weights, biases, stream_dtype=jnp.bfloat16) -> EnsembleParams:
    """weights: [M, H, C], biases: [M, C]. Call once; reuse across forwards."""
    M, H, C = weights.shape
    assert biases.shape == (M, C)
    C_pad = _round_up(C, 128)
    w_p = jnp.pad(weights, ((0, 0), (0, 0), (0, C_pad - C)))
    w_all = jnp.transpose(w_p, (1, 0, 2)).reshape(H, M * C_pad).astype(stream_dtype)
    b_p = jnp.pad(biases.astype(jnp.float32), ((0, 0), (0, C_pad - C)),
                  constant_values=-1e30)
    b_all = b_p.reshape(1, M * C_pad)
    return EnsembleParams(w_all, b_all, M, C, C_pad, H)


# ---------------------------------------------------------------------------
# Tiling heuristics
# ---------------------------------------------------------------------------
_VMEM_BUDGET = 40 << 20   # target footprint; fits v7x (64 MiB) with headroom


def _pick_h_tile(H: int) -> int:
    """K-tile only when H is large and cleanly divisible by a 128-multiple."""
    if H % 128 != 0 or H <= 512:
        return H
    for cand in (1024, 512, 256, 128):
        if H % cand == 0 and H // cand >= 2:
            return cand
    return H


def _vmem_estimate(block_b, h_tile, n_fused, c_pad, num_k, w_itemsize, out_itemsize):
    est = 2 * block_b * h_tile * 4              # x blocks (f32, double buffered)
    est += 2 * h_tile * n_fused * w_itemsize    # W blocks (double buffered)
    est += 2 * 8 * n_fused * 4                  # bias blocks (sublane padded)
    est += 2 * block_b * c_pad * out_itemsize   # output blocks
    if num_k > 1:
        est += block_b * n_fused * 4            # f32 logits accumulator scratch
    est += block_b * n_fused * 4                # live softmax intermediates (headroom)
    return est


# ---------------------------------------------------------------------------
# Forward
# ---------------------------------------------------------------------------
def ensemble_forward(x, params: EnsembleParams, *, block_b=None,
                     out_dtype=jnp.float32):
    """log(mean_m softmax(x @ W_m + b_m, axis=-1)).  x: [B, H] f32 -> [B, C]."""
    B, H = x.shape
    assert H == params.hidden
    M, C, C_pad = params.n_models, params.n_classes, params.c_pad
    N = M * C_pad
    w_itemsize = jnp.dtype(params.w_all.dtype).itemsize
    out_itemsize = jnp.dtype(out_dtype).itemsize

    h_tile = _pick_h_tile(H)
    num_k = H // h_tile

    # Batch tile: enough grid steps to feed both v7x TensorCores / the pipeline,
    # capped at 256 (v5e-friendly) and shrunk further to respect the VMEM budget.
    if block_b is None:
        if B < 128:
            block_b = _round_up(max(B, 8), 8)
        else:
            block_b = min(256, max(64, _round_up(_cdiv(B, 4), 8)))
    block_b = _round_up(block_b, 8)
    while (_vmem_estimate(block_b, h_tile, N, C_pad, num_k, w_itemsize,
                          out_itemsize) > _VMEM_BUDGET and block_b > 8):
        block_b = max(8, _round_up(block_b // 2, 8))

    est = _vmem_estimate(block_b, h_tile, N, C_pad, num_k, w_itemsize, out_itemsize)
    vmem_limit = int(min(64 << 20, max(32 << 20, est + est // 2 + (4 << 20))))

    # Pad B so every output tile is a full rectangular store (no ragged step).
    B_pad = _round_up(B, block_b)
    x_in = x if B_pad == B else jnp.pad(x, ((0, B_pad - B), (0, 0)))
    num_b = B_pad // block_b

    kernel = functools.partial(_ensemble_kernel, n_models=M, c_pad=C_pad)

    if num_k == 1:
        grid = (num_b,)
        in_specs = [
            pl.BlockSpec((block_b, H), lambda i: (i, 0)),   # batch tile
            pl.BlockSpec((H, N), lambda i: (0, 0)),         # resident weights
            pl.BlockSpec((1, N), lambda i: (0, 0)),         # resident biases
        ]
        out_specs = pl.BlockSpec((block_b, C_pad), lambda i: (i, 0))
        scratch_shapes = []
        dim_sem = ("parallel",)
    else:
        grid = (num_b, num_k)
        in_specs = [
            pl.BlockSpec((block_b, h_tile), lambda i, k: (i, k)),
            pl.BlockSpec((h_tile, N), lambda i, k: (k, 0)),  # streamed over K
            pl.BlockSpec((1, N), lambda i, k: (0, 0)),
        ]
        out_specs = pl.BlockSpec((block_b, C_pad), lambda i, k: (i, 0))
        scratch_shapes = [pltpu.VMEM((block_b, N), jnp.float32)]
        dim_sem = ("parallel", "arbitrary")

    out_padded = pl.pallas_call(
        kernel,
        out_shape=jax.ShapeDtypeStruct((B_pad, C_pad), out_dtype),
        grid_spec=pltpu.PrefetchScalarGridSpec(
            num_scalar_prefetch=0,
            grid=grid,
            in_specs=in_specs,
            out_specs=out_specs,
            scratch_shapes=scratch_shapes,
        ),
        compiler_params=pltpu.CompilerParams(
            dimension_semantics=dim_sem,
            vmem_limit_bytes=vmem_limit,
        ),
    )(x_in, params.w_all, params.b_all)

    return out_padded[:B, :C]


# ---------------------------------------------------------------------------
# Reference & test
# ---------------------------------------------------------------------------
def ensemble_reference(x, weights, biases):
    """Pure-JAX reference matching the PyTorch forward (after_softmax=True)."""
    logits = jnp.einsum("bh,mhc->mbc", x, weights) + biases[:, None, :]
    probs = jax.nn.softmax(logits, axis=-1)   # torch dim=1 == class axis here
    return jnp.log(jnp.mean(probs, axis=0))


if __name__ == "__main__":
    # Small, deterministic problem: 3 linear-classifier ensemble members.
    B, H, C, M = 8, 32, 16, 3

    key = jax.random.PRNGKey(0)
    kx, kw, kb = jax.random.split(key, 3)
    x = jax.random.normal(kx, (B, H), dtype=jnp.float32)
    weights = 0.1 * jax.random.normal(kw, (M, H, C), dtype=jnp.float32)
    biases = 0.05 * jax.random.normal(kb, (M, C), dtype=jnp.float32)

    # One-time weight/bias prepacking (reused across forward calls).
    params = prepack_ensemble_params(weights, biases, stream_dtype=jnp.bfloat16)
    params = jax.tree_util.tree_map(
        lambda a: jax.block_until_ready(a) if isinstance(a, jax.Array) else a, params)

    out = ensemble_forward(x, params)
    out = jax.block_until_ready(out)

    ref = ensemble_reference(x, weights, biases)
    assert out.shape == (B, C)
    # Tolerance accounts for bf16 weight streaming and the approx reciprocal.
    assert jnp.allclose(out, ref, atol=2e-2, rtol=0.0), (
        f"max abs err {jnp.max(jnp.abs(out - ref))}"
    )

    print("KERNEL_OK")
</pallas_src>

<mosaic_0001>
module attributes {stable_mosaic.version = 11 : i64} {
  func.func @_ensemble_kernel(%arg0: i32, %arg1: memref<8x32xf32, #tpu.memory_space<vmem>>, %arg2: memref<32x384xbf16, #tpu.memory_space<vmem>>, %arg3: memref<1x384xf32, #tpu.memory_space<vmem>>, %arg4: memref<8x128xf32, #tpu.memory_space<vmem>>) attributes {dimension_semantics = [#tpu.dimension_semantics<parallel>], iteration_bounds = array<i64: 1>, scalar_prefetch = 0 : i64, scratch_operands = 0 : i64, tpu.core_type = #tpu.core_type<tc>, window_params = [{transform_indices = @transform_0, window_bounds = array<i64: 8, 32>}, {pipeline_mode = #tpu.pipeline_mode<synchronous>, transform_indices = @transform_1, window_bounds = array<i64: 32, 384>}, {pipeline_mode = #tpu.pipeline_mode<synchronous>, transform_indices = @transform_2, window_bounds = array<i64: 1, 384>}, {transform_indices = @transform_3, window_bounds = array<i64: 8, 128>}]} {
    %c0 = arith.constant 0 : index
    %c0_0 = arith.constant 0 : index
    %0 = vector.load %arg1[%c0, %c0_0] : memref<8x32xf32, #tpu.memory_space<vmem>>, vector<8x32xf32>
    %1 = arith.truncf %0 : vector<8x32xf32> to vector<8x32xbf16>
    %c0_1 = arith.constant 0 : index
    %c0_2 = arith.constant 0 : index
    %2 = vector.load %arg2[%c0_1, %c0_2] : memref<32x384xbf16, #tpu.memory_space<vmem>>, vector<32x384xbf16>
    %cst = arith.constant dense<0.000000e+00> : vector<8x384xf32>
    %3 = tpu.matmul %1, %2, %cst {dimension_numbers = #tpu.dot_dimension_numbers<[1], [0], [0], [1], [0, 0, 1, 1], [], []>} : vector<8x32xbf16>, vector<32x384xbf16>, vector<8x384xf32> -> vector<8x384xf32>
    %c0_3 = arith.constant 0 : index
    %c0_4 = arith.constant 0 : index
    %4 = vector.load %arg3[%c0_3, %c0_4] : memref<1x384xf32, #tpu.memory_space<vmem>>, vector<1x384xf32>
    %5 = vector.broadcast %4 : vector<1x384xf32> to vector<8x384xf32>
    %6 = arith.addf %3, %5 : vector<8x384xf32>
    %7 = vector.extract_strided_slice %6 {offsets = [0, 0], sizes = [8, 128], strides = [1, 1]} : vector<8x384xf32> to vector<8x128xf32>
    %cst_5 = arith.constant dense<0xFF800000> : vector<8xf32>
    %8 = vector.multi_reduction <maximumf>, %7, %cst_5 [1] : vector<8x128xf32> to vector<8xf32>
    %9 = vector.shape_cast %8 : vector<8xf32> to vector<8x1xf32>
    %10 = vector.broadcast %9 : vector<8x1xf32> to vector<8x128xf32>
    %11 = arith.subf %7, %10 : vector<8x128xf32>
    %12 = math.exp %11 : vector<8x128xf32>
    %cst_6 = arith.constant dense<0.000000e+00> : vector<8xf32>
    %13 = vector.multi_reduction <add>, %12, %cst_6 [1] : vector<8x128xf32> to vector<8xf32>
    %14 = vector.shape_cast %13 : vector<8xf32> to vector<8x1xf32>
    %cst_7 = arith.constant 3.000000e+00 : f32
    %15 = vector.broadcast %cst_7 : f32 to vector<8x1xf32>
    %16 = arith.mulf %14, %15 : vector<8x1xf32>
    %17 = tpu.reciprocal %16 {approx = true} : vector<8x1xf32> -> vector<8x1xf32>
    %18 = vector.broadcast %17 : vector<8x1xf32> to vector<8x128xf32>
    %19 = arith.mulf %12, %18 : vector<8x128xf32>
    %20 = vector.extract_strided_slice %6 {offsets = [0, 128], sizes = [8, 128], strides = [1, 1]} : vector<8x384xf32> to vector<8x128xf32>
    %cst_8 = arith.constant dense<0xFF800000> : vector<8xf32>
    %21 = vector.multi_reduction <maximumf>, %20, %cst_8 [1] : vector<8x128xf32> to vector<8xf32>
    %22 = vector.shape_cast %21 : vector<8xf32> to vector<8x1xf32>
    %23 = vector.broadcast %22 : vector<8x1xf32> to vector<8x128xf32>
    %24 = arith.subf %20, %23 : vector<8x128xf32>
    %25 = math.exp %24 : vector<8x128xf32>
    %cst_9 = arith.constant dense<0.000000e+00> : vector<8xf32>
    %26 = vector.multi_reduction <add>, %25, %cst_9 [1] : vector<8x128xf32> to vector<8xf32>
    %27 = vector.shape_cast %26 : vector<8xf32> to vector<8x1xf32>
    %cst_10 = arith.constant 3.000000e+00 : f32
    %28 = vector.broadcast %cst_10 : f32 to vector<8x1xf32>
    %29 = arith.mulf %27, %28 : vector<8x1xf32>
    %30 = tpu.reciprocal %29 {approx = true} : vector<8x1xf32> -> vector<8x1xf32>
    %31 = vector.broadcast %30 : vector<8x1xf32> to vector<8x128xf32>
    %32 = arith.mulf %25, %31 : vector<8x128xf32>
    %33 = arith.addf %19, %32 : vector<8x128xf32>
    %34 = vector.extract_strided_slice %6 {offsets = [0, 256], sizes = [8, 128], strides = [1, 1]} : vector<8x384xf32> to vector<8x128xf32>
    %cst_11 = arith.constant dense<0xFF800000> : vector<8xf32>
    %35 = vector.multi_reduction <maximumf>, %34, %cst_11 [1] : vector<8x128xf32> to vector<8xf32>
    %36 = vector.shape_cast %35 : vector<8xf32> to vector<8x1xf32>
    %37 = vector.broadcast %36 : vector<8x1xf32> to vector<8x128xf32>
    %38 = arith.subf %34, %37 : vector<8x128xf32>
    %39 = math.exp %38 : vector<8x128xf32>
    %cst_12 = arith.constant dense<0.000000e+00> : vector<8xf32>
    %40 = vector.multi_reduction <add>, %39, %cst_12 [1] : vector<8x128xf32> to vector<8xf32>
    %41 = vector.shape_cast %40 : vector<8xf32> to vector<8x1xf32>
    %cst_13 = arith.constant 3.000000e+00 : f32
    %42 = vector.broadcast %cst_13 : f32 to vector<8x1xf32>
    %43 = arith.mulf %41, %42 : vector<8x1xf32>
    %44 = tpu.reciprocal %43 {approx = true} : vector<8x1xf32> -> vector<8x1xf32>
    %45 = vector.broadcast %44 : vector<8x1xf32> to vector<8x128xf32>
    %46 = arith.mulf %39, %45 : vector<8x128xf32>
    %47 = arith.addf %33, %46 : vector<8x128xf32>
    %48 = math.log %47 : vector<8x128xf32>
    %c0_14 = arith.constant 0 : index
    %c0_15 = arith.constant 0 : index
    %49 = vector.load %arg4[%c0_14, %c0_15] : memref<8x128xf32, #tpu.memory_space<vmem>>, vector<8x128xf32>
    tpu.vector_store %arg4[%c0_14, %c0_15], %48 {strides = array<i32>} : memref<8x128xf32, #tpu.memory_space<vmem>>, vector<8x128xf32>,
    return
  }
  func.func @transform_0(%arg0: i32) -> (i32, i32) {
    %c0_i32 = arith.constant 0 : i32
    %c0_i32_0 = arith.constant 0 : i32
    return %arg0, %c0_i32 : i32, i32
  }
  func.func @transform_1(%arg0: i32) -> (i32, i32) {
    %c0_i32 = arith.constant 0 : i32
    %c0_i32_0 = arith.constant 0 : i32
    %c0_i32_1 = arith.constant 0 : i32
    return %c0_i32, %c0_i32_0 : i32, i32
  }
  func.func @transform_2(%arg0: i32) -> (i32, i32) {
    %c0_i32 = arith.constant 0 : i32
    %c0_i32_0 = arith.constant 0 : i32
    %c0_i32_1 = arith.constant 0 : i32
    return %c0_i32, %c0_i32_0 : i32, i32
  }
  func.func @transform_3(%arg0: i32) -> (i32, i32) {
    %c0_i32 = arith.constant 0 : i32
    %c0_i32_0 = arith.constant 0 : i32
    return %arg0, %c0_i32 : i32, i32
  }
}

</mosaic_0001>

<bundles_post_ra>
// kernel: tpu_custom_call.1
= control target key start
LH: loop header
LB: loop body
LE: loop exit
PB: predicated region body
PF: predicated region fallthrough
CT: control target
= control target key end

     0   :  { %8 = vsyncpa [#allocation3], 0  ;;  %s392_s0 = inlined_call_operand.hbm [shape: f32[8,32], index: 0, kind: input, shape index: {}]   ;;  %s393_s1 = inlined_call_operand.hbm [shape: bf16[32,384], index: 1, kind: input, shape index: {}]   ;;  %s394_s2 = inlined_call_operand.vmem [shape: f32[1,384], index: 2, kind: input, shape index: {}]   ;;  %s395_s3 = inlined_call_operand.hbm [shape: f32[8,128], index: 3, kind: output, shape index: {}]  }
   0x1   :  { %9 = vsyncpa [#allocation6], 0 }
   0x2   :  { %10 = vsyncpa [#allocation4], 0  ;;  %s352_s12 = smov [#allocation2]   ;;  %s353_s14 = smov [#allocation5]  }
   0x3   :  { %s17_s13 = sshll.u32 %s352_s12, 4  ;;  %s26_s15 = sshll.u32 %s353_s14, 4  ;;  %s18_s13 = int_to_ptr.vmem [resolvable:$true] %s17_s13  ;;  %s27_s15 = int_to_ptr.vmem [resolvable:$true] %s26_s15 }
   0x4   :  { %s294_s16 = scalar_lea.vmem %s18_s13, 128  ;;  %p299_p1 = scmp.lt.s32.totalorder %s18_s13, %s18_s13 }
   0x5   :  { %p295_p0 = scmp.ne.s32.totalorder %s18_s13, %s294_s16  ;;  %p300_p2 = scmp.lt.s32.totalorder %s294_s16, %s294_s16 }
   0x7   :  { %p301_p3 = por %p300_p2, %p299_p1 }
   0x9   :  { %p302_p4 = pnand %p301_p3, %p295_p0 }
   0xb   :  { %305 = shalt.err (!%p302_p4)
}
   0xc   :  { %20 = dma.hbm_to_vmem [thread:$0]  %s392_s0, 128, %s18_s13, [#allocation3]  }
   0xd   :  { %s314_s19 = scalar_lea.vmem %s27_s15, 768  ;;  %p319_p6 = scmp.lt.s32.totalorder %s27_s15, %s27_s15 }
   0xe   :  { %p315_p5 = scmp.ne.s32.totalorder %s27_s15, %s314_s19  ;;  %p320_p7 = scmp.lt.s32.totalorder %s314_s19, %s314_s19 }
  0x10   :  { %p321_p8 = por %p320_p7, %p319_p6 }
  0x12   :  { %p322_p9 = pnand %p321_p8, %p315_p5 }
  0x14   :  { %325 = shalt.err (!%p322_p9)
}
  0x15   :  { %s354_s20 = smov 192   ;;  %s355_s21 = smov 12  }
  0x16   :  { %32 = dma.hbm_to_vmem [thread:$0]  %s393_s1, 768, %s27_s15, [#allocation6], %s354_s20, %s354_s20, %s355_s21  }
  0x17   :  { %346 = dma.done.wait [#allocation3], 128  }
  0x18   :  { %347 = vsyncadd [#allocation3], 4294967168 }
  0x19   :  { %348 = dma.done.wait [#allocation6], 768  }
  0x1a   :  { %349 = vsyncadd [#allocation6], 4294966528  ;;  %v356_v0 = vmov 0.0   ;;  %vm357_vm0 = vmmov 0   ;;  %v358_v1 = vmov 0   ;;  %v42_v8 = vld [vmem:[#allocation2] sm:$0xff]  ;;  %v54_v10 = vlaneseq }
  0x1b   :  { %248 = vmatprep.subr.bf16.mxu1 %v356_v0  ;;  %252 = vmatprep.mubr.msk.bf16.mxu1 %vm357_vm0, %v356_v0  ;;  %v264_v2 = vld [vmem:[#allocation5 + $0x1c] ss:$12 sps:$4 sm:$0xff]   ;;  %v266_v3 = vld [vmem:[#allocation5 + $0x20] ss:$12 sps:$4 sm:$0xff]   ;;  %v267_v4 = vld [vmem:[#allocation5 + $0x18] ss:$12 sps:$4 sm:$0xff]   ;;  %v43_v9 = vpack.c.bf16 %v42_v8, %v42_v8 }
  0x1c   :  { %137 = vmatprep.mubr.bf16.mxu0 %v358_v1  ;;  %117 = vmatprep.subr.bf16.mxu0 %v264_v2  ;;  %v268_v5 = vld [vmem:[#allocation5 + $0x4] ss:$12 sps:$4 sm:$0xff]   ;;  %v270_v6 = vld [vmem:[#allocation5 + $0x8] ss:$12 sps:$4 sm:$0xff]   ;;  %v271_v7 = vld [vmem:[#allocation5] ss:$12 sps:$4 sm:$0xff]  }
  0x1d   :  { %249 = vmatpush3.bf16.msra.mxu1 %v266_v3  ;;  %118 = vmatpush1.bf16.msra.mxu0 %v267_v4  ;;  %vm101_vm1 = vcmask 261120   ;;  %v55_v11 = vshrl.u32 %v54_v10, 7  ;;  %v52_v13 = vld [vmem:[%s394_s2] sm:$0x7]  ;;  %s359_s2 = smov [#allocation7]  }
  0x1e   :  { %250 = vmatprep.subr.bf16.mxu1 %v356_v0  ;;  %119 = vmatprep.subr.bf16.mxu0 %v268_v5  ;;  %s227_s24 = sshll.u32 %s359_s2, 4  ;;  %s228_s24 = int_to_ptr.vmem [resolvable:$true] %s227_s24 }
  0x1f   :  { %v64_v12 = vsub.s32 2, %v55_v11  ;;  %v56_v14 = vsub.s32 0, %v55_v11  ;;  %v60_v17 = vsub.s32 1, %v55_v11  ;;  %s326_s25 = scalar_lea.vmem %s228_s24, 128  ;;  %p331_p11 = scmp.lt.s32.totalorder %s228_s24, %s228_s24 }
  0x20   :  { %p327_p10 = scmp.ne.s32.totalorder %s228_s24, %s326_s25  ;;  %p332_p12 = scmp.lt.s32.totalorder %s326_s25, %s326_s25 }
  0x21   :  { %251 = vmatpush3.bf16.msra.mxu1 %v270_v6  ;;  %120 = vmatpush1.bf16.msra.mxu0 %v271_v7  ;;  %v65_v15 = vrot.slane %v52_v13, %v64_v12  ;;  %v57_v16 = vrot.slane %v52_v13, %v56_v14  ;;  %v61_v22 = vrot.slane %v52_v13, %v60_v17 }
  0x22   :  { %p333_p13 = por %p332_p12, %p331_p11 }
  0x24   :  { %253 = vmatmul.mubr.msk.bf16.vlgmr.msra.gmra.mxu1 %vm101_vm1, %v43_v9  ;;  %243 = vmatmul.mubr.msk.bf16.vlgmr.msra.gmra.mxu0 %vm101_vm1, %v43_v9  ;;  %p334_p0 = pnand %p333_p13, %p327_p10 }
  0xe4   :  { %v180_v18 = vpop.f32.mrf.mxu1  ;;  %v139_v20 = vpop.f32.mrf.mxu0 }
  0xe5   :  { %v181_v19 = vadd.f32 %v180_v18, %v65_v15  ;;  %v140_v21 = vadd.f32 %v139_v20, %v57_v16 }
  0xe6   :  { %v254_v23 = vpop.f32.mrf.mxu1  ;;  %v141_v24 = vpop.f32.mrf.mxu0 }
  0xe7   :  { %207 = vmax.xlane.f32.xlu1 %v181_v19  ;;  %186 = vmax.xlane.f32.xlu0 %v140_v21  ;;  %v142_v27 = vadd.f32 %v141_v24, %v61_v22 }
  0xe8   :  { %v183_v25 = vpop.f32.mrf.mxu1  ;;  %v143_v26 = vpop.f32.mrf.mxu0 }
  0xea   :  { %v255_v28 = vpop.f32.mrf.mxu1  ;;  %v144_v29 = vpop.f32.mrf.mxu0 }
  0xeb   :  { %196 = vmax.xlane.f32.xlu0 %v142_v27 }
 0x170   :  { %v208_v30 = vpop.xlane.xlu1 %207  ;;  %v187_v32 = vpop.xlane.xlu0 %186 }
 0x171   :  { %v209_v31 = vsub.f32 %v181_v19, %v208_v30  ;;  %v188_v33 = vsub.f32 %v140_v21, %v187_v32 }
 0x173   :  { %v189_v34 = vmul.f32 1.442695, %v188_v33  ;;  %v210_v35 = vmul.f32 1.442695, %v209_v31 }
 0x174   :  { %v197_v36 = vpop.xlane.xlu0 %196 }
 0x175   :  { %272 = vpow2.f32 %v189_v34  ;;  %v198_v37 = vsub.f32 %v142_v27, %v197_v36 }
 0x176   :  { %274 = vpow2.f32 %v210_v35 }
 0x177   :  { %v199_v38 = vmul.f32 1.442695, %v198_v37 }
 0x179   :  { %276 = vpow2.f32 %v199_v38 }
 0x182   :  { %v273_v39 = vpop.eup %272 }
 0x183   :  { %191 = vadd.xlane.f32.xlu1 %v273_v39  ;;  %v275_v40 = vpop.eup %274 }
 0x186   :  { %v277_v41 = vpop.eup %276 }
 0x187   :  { %212 = vadd.xlane.f32.xlu1 %v275_v40  ;;  %201 = vadd.xlane.f32.xlu0 %v277_v41 }
 0x20c   :  { %v192_v42 = vpop.xlane.xlu1 %191 }
 0x20d   :  { %v193_v43 = vmul.f32 3.0, %v192_v42 }
 0x20f   :  { %278 = vrcp.f32 %v193_v43 }
 0x210   :  { %v213_v44 = vpop.xlane.xlu1 %212  ;;  %v202_v45 = vpop.xlane.xlu0 %201 }
 0x211   :  { %v214_v46 = vmul.f32 3.0, %v213_v44  ;;  %v203_v47 = vmul.f32 3.0, %v202_v45 }
 0x213   :  { %280 = vrcp.f32 %v214_v46 }
 0x214   :  { %282 = vrcp.f32 %v203_v47 }
 0x21c   :  { %v279_v48 = vpop.eup %278 }
 0x21d   :  { %v195_v51 = vmul.f32 %v279_v48, %v273_v39 }
 0x220   :  { %v281_v49 = vpop.eup %280 }
 0x221   :  { %v283_v50 = vpop.eup %282  ;;  %v216_v54 = vmul.f32 %v281_v49, %v275_v40 }
 0x222   :  { %v205_v52 = vmul.f32 %v283_v50, %v277_v41 }
 0x224   :  { %v206_v53 = vadd.f32 %v205_v52, %v195_v51 }
 0x226   :  { %v217_v55 = vadd.f32 %v216_v54, %v206_v53 }
 0x228   :  { %284 = vlog2.f32 %v217_v55 }
 0x235   :  { %v285_v56 = vpop.eup %284 }
 0x236   :  { %v219_v57 = vmul.f32 0.6931472, %v285_v56 }
 0x238   :  { %220 = vst [vmem:[#allocation7] sm:$0xff] %v219_v57 }
 0x239   :  { %337 = shalt.err (!%p334_p0)
}
 0x23a   :  { %230 = dma.vmem_to_hbm [thread:$0]  %s228_s24, 128, %s395_s3, [#allocation4]  }
 0x23b   :  { %350 = dma.done.wait [#allocation4], 128  }
 0x23c   :  { %351 = vsyncadd [#allocation4], 4294967168 }
 0x23d   :  { %234 = vsyncpa [#allocation3], 1 }
 0x23e   :  { %235 = vsyncpa [#allocation6], 1 }
 0x23f   :  { %236 = vsyncpa [#allocation4], 1 }

</bundles_post_ra>
